<compile_context>
chip_gen: v5e
topology: v5e:2x2
jax: 0.10.0
libtpu: 0.0.40
codegen_flags: <defaults>
</compile_context>

<pallas_src>
import numpy as np
import jax
import jax.numpy as jnp
from jax import lax
from jax.experimental import pallas as pl
from jax.experimental.pallas import tpu as pltpu


def _round_up(x, m):
    return ((x + m - 1) // m) * m


# --------------------------------------------------------------------------
# Pallas kernels
# --------------------------------------------------------------------------
def _lin_kernel(x_ref, w_ref, o_ref):
    # x_ref: (tm, V)   w_ref: (V, N)   o_ref: (tm, N)   -- one MXU push per tile
    o_ref[...] = jnp.dot(x_ref[...], w_ref[...],
                         preferred_element_type=jnp.float32).astype(o_ref.dtype)


def _emb_kernel(idx_ref, w_ref, o_ref):
    # idx_ref: (Mp,) int32 in SMEM (scalar-prefetched indices)
    # w_ref:   (V, N) weight table, resident in VMEM (grid-invariant block)
    # o_ref:   (tm, N) gathered rows; N is a multiple of 128 -> lane-dense stores
    tm = o_ref.shape[0]
    base = pl.program_id(0) * tm

    def body(r, carry):
        o_ref[r, :] = w_ref[idx_ref[base + r], :]
        return carry

    lax.fori_loop(0, tm, body, 0, unroll=(tm <= 64))


# --------------------------------------------------------------------------
# Wrappers
# --------------------------------------------------------------------------
def emblin2_lin(x, weight, *, tm_max=512):
    """mode='lin': x.matmul(weight).  x: (..., V) float, weight: (V, E*G)."""
    *batch, K = x.shape
    V, N = weight.shape
    assert K == V, (K, V)
    M = int(np.prod(batch)) if batch else 1
    x2 = x.reshape(M, K).astype(jnp.float32)

    tm = _round_up(M, 8) if M <= tm_max else tm_max
    Mp = _round_up(M, tm)
    if Mp != M:
        x2 = jnp.pad(x2, ((0, Mp - M), (0, 0)))

    out = pl.pallas_call(
        _lin_kernel,
        out_shape=jax.ShapeDtypeStruct((Mp, N), jnp.float32),
        grid_spec=pltpu.PrefetchScalarGridSpec(
            num_scalar_prefetch=0,
            grid=(Mp // tm,),
            in_specs=[
                pl.BlockSpec((tm, K), lambda i: (i, 0)),
                # full, grid-invariant weight block -> fetched once, VMEM-resident
                pl.BlockSpec((V, N), lambda i: (0, 0)),
            ],
            out_specs=pl.BlockSpec((tm, N), lambda i: (i, 0)),
        ),
        compiler_params=pltpu.CompilerParams(
            dimension_semantics=("parallel",)),
    )(x2, weight.astype(jnp.float32))
    if Mp != M:
        out = out[:M]
    return out.reshape(*batch, N)


def emblin2_emb(idx, weight, *, tm_max=512):
    """mode='emb': embedding lookup weight[idx].  idx: (...,) integer array."""
    batch = idx.shape
    V, N = weight.shape
    M = int(np.prod(batch)) if batch else 1
    idx1 = idx.reshape(M).astype(jnp.int32)

    tm = _round_up(M, 8) if M <= tm_max else tm_max
    Mp = _round_up(M, tm)
    if Mp != M:
        idx1 = jnp.pad(idx1, (0, Mp - M))   # padded rows gather row 0, sliced off below

    out = pl.pallas_call(
        _emb_kernel,
        out_shape=jax.ShapeDtypeStruct((Mp, N), jnp.float32),
        grid_spec=pltpu.PrefetchScalarGridSpec(
            num_scalar_prefetch=1,                      # idx1 -> SMEM
            grid=(Mp // tm,),
            in_specs=[
                pl.BlockSpec((V, N), lambda i, idx_ref: (0, 0)),
            ],
            out_specs=pl.BlockSpec((tm, N), lambda i, idx_ref: (i, 0)),
        ),
        compiler_params=pltpu.CompilerParams(
            dimension_semantics=("parallel",)),
    )(idx1, weight.astype(jnp.float32))
    if Mp != M:
        out = out[:M]
    return out.reshape(*batch, N)


class EmbLin2:
    """JAX/Pallas port of the PyTorch EmbLin2 module (forward pass only)."""

    def __init__(self, key, num_embeddings, embedding_dim, groups=1):
        self.num_embeddings = num_embeddings
        self.embedding_dim = embedding_dim
        self.groups = groups
        # nn.Embedding default init: N(0, 1)
        self.weight = jax.random.normal(
            key, (num_embeddings, embedding_dim * groups), jnp.float32)

    def forward(self, x, mode='lin'):
        if mode == 'lin':
            return emblin2_lin(x, self.weight)
        elif mode == 'emb':
            return emblin2_emb(x, self.weight)
        raise ValueError(f"unknown mode: {mode}")


# --------------------------------------------------------------------------
if __name__ == "__main__":
    # Small shapes consistent with the module: weight is (32, 32*4) = (32, 128)
    num_embeddings, embedding_dim, groups = 32, 32, 4
    N_batch, T = 2, 16

    key = jax.random.PRNGKey(0)
    key, kw, kx, ki = jax.random.split(key, 4)
    mod = EmbLin2(kw, num_embeddings, embedding_dim, groups)

    # ---- mode='lin': (2, 16, 32) @ (32, 128) -> (2, 16, 128) ----
    x_lin = jax.random.normal(kx, (N_batch, T, num_embeddings), jnp.float32)
    out_lin = jax.block_until_ready(mod.forward(x_lin, mode='lin'))
    ref_lin = jnp.matmul(x_lin, mod.weight)
    assert out_lin.shape == (N_batch, T, embedding_dim * groups), out_lin.shape
    np.testing.assert_allclose(np.asarray(out_lin), np.asarray(ref_lin),
                               rtol=1e-3, atol=1e-3)

    # ---- mode='emb': (2, 16) int indices -> (2, 16, 128) ----
    x_emb = jax.random.randint(ki, (N_batch, T), 0, num_embeddings, jnp.int32)
    out_emb = jax.block_until_ready(mod.forward(x_emb, mode='emb'))
    ref_emb = mod.weight[x_emb]
    assert out_emb.shape == (N_batch, T, embedding_dim * groups), out_emb.shape
    np.testing.assert_allclose(np.asarray(out_emb), np.asarray(ref_emb),
                               rtol=0.0, atol=1e-6)

    print("KERNEL_OK")
</pallas_src>

<mosaic_0001>
module attributes {stable_mosaic.version = 11 : i64} {
  func.func @_lin_kernel(%arg0: i32, %arg1: memref<32x32xf32, #tpu.memory_space<vmem>>, %arg2: memref<32x128xf32, #tpu.memory_space<vmem>>, %arg3: memref<32x128xf32, #tpu.memory_space<vmem>>) attributes {dimension_semantics = [#tpu.dimension_semantics<parallel>], iteration_bounds = array<i64: 1>, scalar_prefetch = 0 : i64, scratch_operands = 0 : i64, tpu.core_type = #tpu.core_type<tc>, window_params = [{transform_indices = @transform_0, window_bounds = array<i64: 32, 32>}, {pipeline_mode = #tpu.pipeline_mode<synchronous>, transform_indices = @transform_1, window_bounds = array<i64: 32, 128>}, {transform_indices = @transform_2, window_bounds = array<i64: 32, 128>}]} {
    %c0 = arith.constant 0 : index
    %c0_0 = arith.constant 0 : index
    %0 = vector.load %arg1[%c0, %c0_0] : memref<32x32xf32, #tpu.memory_space<vmem>>, vector<32x32xf32>
    %c0_1 = arith.constant 0 : index
    %c0_2 = arith.constant 0 : index
    %1 = vector.load %arg2[%c0_1, %c0_2] : memref<32x128xf32, #tpu.memory_space<vmem>>, vector<32x128xf32>
    %cst = arith.constant dense<0.000000e+00> : vector<32x128xf32>
    %2 = tpu.matmul %0, %1, %cst {dimension_numbers = #tpu.dot_dimension_numbers<[1], [0], [0], [1], [0, 0, 1, 1], [], []>} : vector<32x32xf32>, vector<32x128xf32>, vector<32x128xf32> -> vector<32x128xf32>
    %c0_3 = arith.constant 0 : index
    %c0_4 = arith.constant 0 : index
    %3 = vector.load %arg3[%c0_3, %c0_4] : memref<32x128xf32, #tpu.memory_space<vmem>>, vector<32x128xf32>
    tpu.vector_store %arg3[%c0_3, %c0_4], %2 {strides = array<i32>} : memref<32x128xf32, #tpu.memory_space<vmem>>, vector<32x128xf32>,
    return
  }
  func.func @transform_0(%arg0: i32) -> (i32, i32) {
    %c0_i32 = arith.constant 0 : i32
    %c0_i32_0 = arith.constant 0 : i32
    return %arg0, %c0_i32 : i32, i32
  }
  func.func @transform_1(%arg0: i32) -> (i32, i32) {
    %c0_i32 = arith.constant 0 : i32
    %c0_i32_0 = arith.constant 0 : i32
    %c0_i32_1 = arith.constant 0 : i32
    return %c0_i32, %c0_i32_0 : i32, i32
  }
  func.func @transform_2(%arg0: i32) -> (i32, i32) {
    %c0_i32 = arith.constant 0 : i32
    %c0_i32_0 = arith.constant 0 : i32
    return %arg0, %c0_i32 : i32, i32
  }
}

</mosaic_0001>

<bundles_post_ra>
// kernel: tpu_custom_call.1
= control target key start
LH: loop header
LB: loop body
LE: loop exit
PB: predicated region body
PF: predicated region fallthrough
CT: control target
= control target key end

     0   :  { %7 = vsyncpa [#allocation3], 0  ;;  %s255_s0 = inlined_call_operand.hbm [shape: f32[32,32], index: 0, kind: input, shape index: {}]   ;;  %s256_s1 = inlined_call_operand.hbm [shape: f32[32,128], index: 1, kind: input, shape index: {}]   ;;  %s257_s2 = inlined_call_operand.hbm [shape: f32[32,128], index: 2, kind: output, shape index: {}]  }
   0x1   :  { %8 = vsyncpa [#allocation6], 0 }
   0x2   :  { %9 = vsyncpa [#allocation4], 0  ;;  %s14_s11 = sshll.u32 %s255_s0, 4  ;;  %s217_s12 = smov [#allocation2]   ;;  %s15_s11 = int_to_ptr.hbm [resolvable:$true] %s14_s11 }
   0x3   :  { %s16_s13 = sshll.u32 %s217_s12, 4  ;;  %s27_s16 = sshll.u32 %s256_s1, 4  ;;  %s17_s13 = int_to_ptr.vmem [resolvable:$true] %s16_s13  ;;  %s28_s16 = int_to_ptr.hbm [resolvable:$true] %s27_s16 }
   0x4   :  { %s218_s17 = smov 128   ;;  %s219_s18 = smov 8  }
   0x5   :  { %22 = dma.hbm_to_vmem [thread:$0]  %s15_s11, 512, %s17_s13, [#allocation3], %s218_s17, %s218_s17, %s219_s18  }
   0x6   :  { %s220_s19 = smov [#allocation5]  }
   0x7   :  { %s29_s20 = sshll.u32 %s220_s19, 4  ;;  %s30_s20 = int_to_ptr.vmem [resolvable:$true] %s29_s20 }
   0x8   :  { %35 = dma.hbm_to_vmem [thread:$0]  %s28_s16, 512, %s30_s20, [#allocation6], %s218_s17, %s218_s17, %s219_s18  }
   0x9   :  { %211 = dma.done.wait [#allocation3], 512  }
   0xa   :  { %212 = vsyncadd [#allocation3], 4294966784 }
   0xb   :  { %213 = dma.done.wait [#allocation6], 512  }
   0xc   :  { %214 = vsyncadd [#allocation6], 4294966784  ;;  %v51_v0 = vld [vmem:[#allocation5 + $0x18] sm:$0xff]  ;;  %v50_v1 = vld [vmem:[#allocation5 + $0x10] sm:$0xff]  ;;  %vm52_vm0 = vcmask 261120   ;;  %s221_s0 = smov [#allocation7]  }
   0xd   :  { %123 = vmatpush.msra.mxu2 %v51_v0  ;;  %124 = vmatpush.msra.mxu3 %v51_v0  ;;  %v49_v2 = vld [vmem:[#allocation5 + $0x8] sm:$0xff]  ;;  %v48_v3 = vld [vmem:[#allocation5] sm:$0xff]  ;;  %v46_v4 = vld [vmem:[#allocation2 + $0x10] sm:$0xff]  ;;  %s102_s1 = sshll.u32 %s221_s0, 4  ;;  %s104_s23 = sshll.u32 %s257_s2, 4  ;;  %s103_s1 = int_to_ptr.vmem [resolvable:$true] %s102_s1  ;;  %s105_s23 = int_to_ptr.hbm [resolvable:$true] %s104_s23 }
   0xe   :  { %77 = vmatpush.msra.mxu0 %v51_v0  ;;  %122 = vmatpush.msra.mxu1 %v51_v0  ;;  %v47_v5 = vld [vmem:[#allocation2 + $0x18] sm:$0xff]  ;;  %v44_v6 = vld [vmem:[#allocation2] sm:$0xff]  ;;  %v45_v7 = vld [vmem:[#allocation2 + $0x8] sm:$0xff] }
   0xf   :  { %126 = vmatpush.msra.mxu2 %v50_v1  ;;  %127 = vmatpush.msra.mxu3 %v50_v1 }
  0x10   :  { %78 = vmatpush.msra.mxu0 %v50_v1  ;;  %125 = vmatpush.msra.mxu1 %v50_v1 }
  0x11   :  { %129 = vmatpush.msra.mxu2 %v49_v2  ;;  %130 = vmatpush.msra.mxu3 %v49_v2 }
  0x12   :  { %79 = vmatpush.msra.mxu0 %v49_v2  ;;  %128 = vmatpush.msra.mxu1 %v49_v2 }
  0x13   :  { %132 = vmatpush.msra.mxu2 %v48_v3  ;;  %133 = vmatpush.msra.mxu3 %v48_v3 }
  0x14   :  { %120 = vmatmul.msk.f32.vlgmr.msra.gmra.mxu2 %vm52_vm0, %v46_v4  ;;  %121 = vmatmul.msk.f32.vlgmr.msra.gmra.mxu3 %vm52_vm0, %v47_v5 }
  0x15   :  { %80 = vmatpush.msra.mxu0 %v48_v3  ;;  %131 = vmatpush.msra.mxu1 %v48_v3 }
  0x16   :  { %118 = vmatmul.msk.f32.vlgmr.msra.gmra.mxu0 %vm52_vm0, %v44_v6  ;;  %119 = vmatmul.msk.f32.vlgmr.msra.gmra.mxu1 %vm52_vm0, %v45_v7 }
  0x93   :  { %v82_v8 = vpop.f32.mrf.mxu0  ;;  %v85_v9 = vpop.f32.mrf.mxu1 }
  0x94   :  { %94 = vst [vmem:[#allocation7] sm:$0xff] %v82_v8 }
  0x95   :  { %95 = vst [vmem:[#allocation7 + $0x8] sm:$0xff] %v85_v9 }
  0x97   :  { %v88_v10 = vpop.f32.mrf.mxu2  ;;  %v91_v11 = vpop.f32.mrf.mxu3 }
  0x98   :  { %96 = vst [vmem:[#allocation7 + $0x10] sm:$0xff] %v88_v10 }
  0x99   :  { %97 = vst [vmem:[#allocation7 + $0x18] sm:$0xff] %v91_v11 }
  0x9a   :  { %110 = dma.vmem_to_hbm [thread:$0]  %s103_s1, 512, %s105_s23, [#allocation4], %s218_s17, %s218_s17, %s219_s18  }
  0x9b   :  { %215 = dma.done.wait [#allocation4], 512  }
  0x9c   :  { %216 = vsyncadd [#allocation4], 4294966784 }
  0x9d   :  { %115 = vsyncpa [#allocation3], 1 }
  0x9e   :  { %116 = vsyncpa [#allocation6], 1 }
  0x9f   :  { %117 = vsyncpa [#allocation4], 1 }

</bundles_post_ra>
